<compile_context>
chip_gen: v7x
topology: tpu7x:2x2x1
jax: 0.10.0
libtpu: 0.0.40
codegen_flags: <defaults>
</compile_context>

<pallas_src>
import functools

import jax
import jax.numpy as jnp
from jax.experimental import pallas as pl
from jax.experimental.pallas import tpu as pltpu


def two_linear_kernel(x_ref, y_ref, w_ref, b_ref, o_ref):
    k = x_ref.shape[-1]
    # Two K-deep MXU contractions against the VMEM-resident fused weight.
    # f32 inputs + HIGHEST precision: the MXU is nowhere near the bottleneck,
    # so the extra passes are free and accuracy matches plain f32.
    acc = jnp.dot(
        x_ref[...],
        w_ref[0:k, :],
        preferred_element_type=jnp.float32,
        precision=jax.lax.Precision.HIGHEST,
    )
    acc = acc + jnp.dot(
        y_ref[...],
        w_ref[k:2 * k, :],
        preferred_element_type=jnp.float32,
        precision=jax.lax.Precision.HIGHEST,
    )
    acc = acc + b_ref[...]          # (1, N) f32 bias broadcasts over rows
    o_ref[...] = acc.astype(o_ref.dtype)


def fuse_two_linear_params(w1, b1, w2, b2):
    """One-time parameter fusion (param-init time, NOT the per-call hot path).

    w1, w2: (N, K) PyTorch layout; b1, b2: (N,).
    Returns W_cat (2K, N) f32 and b_sum (1, N) f32.
    """
    n = w1.shape[0]
    w_cat = jnp.concatenate([w1.T, w2.T], axis=0).astype(jnp.float32)  # (2K, N)
    b_sum = (b1 + b2).reshape(1, n).astype(jnp.float32)                # (1, N)
    return w_cat, b_sum


def _round_up(v, m):
    return -(-v // m) * m


def _round_down(v, m):
    return (v // m) * m


@functools.partial(jax.jit, static_argnames=("block_b",))
def two_linear(x, y, w_cat, b_sum, *, block_b=4096):
    """x, y: (B, K) f32; w_cat: (2K, N) f32; b_sum: (1, N) f32 -> (B, N) f32."""
    B, K = x.shape
    K2, N = w_cat.shape  # K2 == 2*K

    # Row-tile selection:
    #   * multiple of 8 (sublane) — never collapse to a giant full-extent block
    #   * capped at ceil(B/2) (rounded up to 8) so the grid has >=2 steps when
    #     possible -> both v7x TensorCores get work under "parallel" semantics
    #   * capped at block_b (default 4096 ≈ 8 MiB double-buffered f32 x/y/out,
    #     safely inside every generation's VMEM budget)
    if B < 8:
        tb = B                                   # full-extent block (only legal choice)
    else:
        tb = min(block_b, _round_up(pl.cdiv(B, 2), 8))
        tb = max(8, _round_down(tb, 8))
    grid = (pl.cdiv(B, tb),)

    itemsize = jnp.dtype(x.dtype).itemsize
    cost = pl.CostEstimate(
        flops=2 * B * K2 * N,
        transcendentals=0,
        bytes_accessed=(
            x.size * itemsize
            + y.size * itemsize
            + w_cat.size * jnp.dtype(w_cat.dtype).itemsize
            + b_sum.size * jnp.dtype(b_sum.dtype).itemsize
            + B * N * itemsize
        ),
    )

    return pl.pallas_call(
        two_linear_kernel,
        out_shape=jax.ShapeDtypeStruct((B, N), x.dtype),
        grid=grid,
        in_specs=[
            pl.BlockSpec((tb, K), lambda i: (i, 0)),    # x tile, pipelined
            pl.BlockSpec((tb, K), lambda i: (i, 0)),    # y tile, pipelined
            pl.BlockSpec((K2, N), lambda i: (0, 0)),    # fused weights, VMEM-resident
            pl.BlockSpec((1, N), lambda i: (0, 0)),     # fused bias, VMEM-resident
        ],
        out_specs=pl.BlockSpec((tb, N), lambda i: (i, 0)),
        compiler_params=pltpu.CompilerParams(
            # Batch tiles are independent -> "parallel": lets v7x shard grid
            # steps across both TensorCores (no-op on v5e/v6e).
            dimension_semantics=("parallel",),
            # Explicit limit: > v5e's 16 MiB scoped default, < v7x's 64 MiB
            # physical VMEM, so larger block_b values remain safe everywhere.
            vmem_limit_bytes=48 * 1024 * 1024,
        ),
        cost_estimate=cost,
    )(x, y, w_cat, b_sum)


if __name__ == "__main__":
    in_features, out_features = 64, 128
    batch = 8

    key = jax.random.PRNGKey(0)
    kx, ky, kw1, kb1, kw2, kb2 = jax.random.split(key, 6)

    # Deterministic parameter init, mimicking torch.nn.Linear's
    # U(-1/sqrt(in_features), 1/sqrt(in_features)) bounds.
    bound = 1.0 / jnp.sqrt(jnp.float32(in_features))
    w1 = jax.random.uniform(kw1, (out_features, in_features), jnp.float32, -bound, bound)
    b1 = jax.random.uniform(kb1, (out_features,), jnp.float32, -bound, bound)
    w2 = jax.random.uniform(kw2, (out_features, in_features), jnp.float32, -bound, bound)
    b2 = jax.random.uniform(kb2, (out_features,), jnp.float32, -bound, bound)

    x = jax.random.normal(kx, (batch, in_features), jnp.float32)
    y = jax.random.normal(ky, (batch, in_features), jnp.float32)

    # One-time parameter fusion (kept out of the per-call hot path).
    w_cat, b_sum = fuse_two_linear_params(w1, b1, w2, b2)

    out = two_linear(x, y, w_cat, b_sum)
    out = jax.block_until_ready(out)

    # Reference in plain f32 JAX (same semantics as the PyTorch module).
    ref = (x @ w1.T + b1) + (y @ w2.T + b2)
    assert out.shape == (batch, out_features)
    assert jnp.allclose(out, ref, atol=1e-4, rtol=1e-4), float(jnp.max(jnp.abs(out - ref)))

    print("KERNEL_OK")
</pallas_src>

<mosaic_0001>
module attributes {stable_mosaic.version = 11 : i64} {
  func.func @two_linear_kernel(%arg0: i32, %arg1: memref<8x64xf32, #tpu.memory_space<vmem>>, %arg2: memref<8x64xf32, #tpu.memory_space<vmem>>, %arg3: memref<128x128xf32, #tpu.memory_space<vmem>>, %arg4: memref<1x128xf32, #tpu.memory_space<vmem>>, %arg5: memref<8x128xf32, #tpu.memory_space<vmem>>) attributes {dimension_semantics = [#tpu.dimension_semantics<parallel>], iteration_bounds = array<i64: 1>, scalar_prefetch = 0 : i64, scratch_operands = 0 : i64, tpu.core_type = #tpu.core_type<tc>, window_params = [{transform_indices = @transform_0, window_bounds = array<i64: 8, 64>}, {transform_indices = @transform_1, window_bounds = array<i64: 8, 64>}, {pipeline_mode = #tpu.pipeline_mode<synchronous>, transform_indices = @transform_2, window_bounds = array<i64: 128, 128>}, {pipeline_mode = #tpu.pipeline_mode<synchronous>, transform_indices = @transform_3, window_bounds = array<i64: 1, 128>}, {transform_indices = @transform_4, window_bounds = array<i64: 8, 128>}]} {
    %c0 = arith.constant 0 : index
    %c0_0 = arith.constant 0 : index
    %0 = vector.load %arg1[%c0, %c0_0] : memref<8x64xf32, #tpu.memory_space<vmem>>, vector<8x64xf32>
    %c0_1 = arith.constant 0 : index
    %c0_2 = arith.constant 0 : index
    %1 = vector.load %arg3[%c0_1, %c0_2] : memref<128x128xf32, #tpu.memory_space<vmem>>, vector<64x128xf32>
    %cst = arith.constant dense<0.000000e+00> : vector<8x128xf32>
    %2 = tpu.matmul %0, %1, %cst {dimension_numbers = #tpu.dot_dimension_numbers<[1], [0], [0], [1], [0, 0, 1, 1], [], []>, precision = #tpu.contract_precision<fp32>} : vector<8x64xf32>, vector<64x128xf32>, vector<8x128xf32> -> vector<8x128xf32>
    %c0_3 = arith.constant 0 : index
    %c0_4 = arith.constant 0 : index
    %3 = vector.load %arg2[%c0_3, %c0_4] : memref<8x64xf32, #tpu.memory_space<vmem>>, vector<8x64xf32>
    %c64 = arith.constant 64 : index
    %c0_5 = arith.constant 0 : index
    %4 = vector.load %arg3[%c64, %c0_5] : memref<128x128xf32, #tpu.memory_space<vmem>>, vector<64x128xf32>
    %cst_6 = arith.constant dense<0.000000e+00> : vector<8x128xf32>
    %5 = tpu.matmul %3, %4, %cst_6 {dimension_numbers = #tpu.dot_dimension_numbers<[1], [0], [0], [1], [0, 0, 1, 1], [], []>, precision = #tpu.contract_precision<fp32>} : vector<8x64xf32>, vector<64x128xf32>, vector<8x128xf32> -> vector<8x128xf32>
    %6 = arith.addf %2, %5 : vector<8x128xf32>
    %c0_7 = arith.constant 0 : index
    %c0_8 = arith.constant 0 : index
    %7 = vector.load %arg4[%c0_7, %c0_8] : memref<1x128xf32, #tpu.memory_space<vmem>>, vector<1x128xf32>
    %8 = vector.broadcast %7 : vector<1x128xf32> to vector<8x128xf32>
    %9 = arith.addf %6, %8 : vector<8x128xf32>
    %c0_9 = arith.constant 0 : index
    %c0_10 = arith.constant 0 : index
    %10 = vector.load %arg5[%c0_9, %c0_10] : memref<8x128xf32, #tpu.memory_space<vmem>>, vector<8x128xf32>
    tpu.vector_store %arg5[%c0_9, %c0_10], %9 {strides = array<i32>} : memref<8x128xf32, #tpu.memory_space<vmem>>, vector<8x128xf32>,
    return
  }
  func.func @transform_0(%arg0: i32) -> (i32, i32) {
    %c0_i32 = arith.constant 0 : i32
    %c0_i32_0 = arith.constant 0 : i32
    return %arg0, %c0_i32 : i32, i32
  }
  func.func @transform_1(%arg0: i32) -> (i32, i32) {
    %c0_i32 = arith.constant 0 : i32
    %c0_i32_0 = arith.constant 0 : i32
    return %arg0, %c0_i32 : i32, i32
  }
  func.func @transform_2(%arg0: i32) -> (i32, i32) {
    %c0_i32 = arith.constant 0 : i32
    %c0_i32_0 = arith.constant 0 : i32
    %c0_i32_1 = arith.constant 0 : i32
    return %c0_i32, %c0_i32_0 : i32, i32
  }
  func.func @transform_3(%arg0: i32) -> (i32, i32) {
    %c0_i32 = arith.constant 0 : i32
    %c0_i32_0 = arith.constant 0 : i32
    %c0_i32_1 = arith.constant 0 : i32
    return %c0_i32, %c0_i32_0 : i32, i32
  }
  func.func @transform_4(%arg0: i32) -> (i32, i32) {
    %c0_i32 = arith.constant 0 : i32
    %c0_i32_0 = arith.constant 0 : i32
    return %arg0, %c0_i32 : i32, i32
  }
}

</mosaic_0001>

<bundles_post_ra>
// kernel: two_linear.1
= control target key start
LH: loop header
LB: loop body
LE: loop exit
PB: predicated region body
PF: predicated region fallthrough
CT: control target
= control target key end

     0   :  { %9 = vsyncpa [#allocation3], 0  ;;  %s2136_s0 = inlined_call_operand.hbm [shape: f32[8,64], index: 0, kind: input, shape index: {}]   ;;  %s2137_s1 = inlined_call_operand.hbm [shape: f32[8,64], index: 1, kind: input, shape index: {}]   ;;  %s2138_s2 = inlined_call_operand.hbm [shape: f32[128,128], index: 2, kind: input, shape index: {}]   ;;  %s2139_s3 = inlined_call_operand.vmem [shape: f32[1,128], index: 3, kind: input, shape index: {}]   ;;  %s2140_s4 = inlined_call_operand.hbm [shape: f32[8,128], index: 4, kind: output, shape index: {}]  }
   0x1   :  { %10 = vsyncpa [#allocation6], 0 }
   0x2   :  { %11 = vsyncpa [#allocation4], 0  ;;  %s1763_s15 = smov [#allocation5]   ;;  %s1764_s17 = smov [#allocation2]  }
   0x3   :  { %s28_s16 = sshll.u32 %s1763_s15, 4  ;;  %s18_s18 = sshll.u32 %s1764_s17, 4  ;;  %s29_s16 = int_to_ptr.vmem [resolvable:$true] %s28_s16  ;;  %s19_s18 = int_to_ptr.vmem [resolvable:$true] %s18_s18 }
   0x4   :  { %s1669_s21 = scalar_lea.hbm %s2137_s1, 128 }
   0x5   :  { %p1670_p0 = scmp.ne.s32.totalorder %s2137_s1, %s1669_s21  ;;  %p1673_p1 = scmp.lt.u32.totalorder %s1669_s21, %s2137_s1 }
   0x7   :  { %p1675_p2 = pnand %p1673_p1, %p1670_p0 }
   0x9   :  { %1678 = shalt.err (!%p1675_p2)
}
   0xa   :  { %s1679_s26 = scalar_lea.vmem %s29_s16, 128  ;;  %p1684_p4 = scmp.lt.s32.totalorder %s29_s16, %s29_s16 }
   0xb   :  { %p1680_p3 = scmp.ne.s32.totalorder %s29_s16, %s1679_s26  ;;  %p1685_p5 = scmp.lt.s32.totalorder %s1679_s26, %s1679_s26 }
   0xd   :  { %p1686_p6 = por %p1685_p5, %p1684_p4 }
   0xf   :  { %p1687_p7 = pnand %p1686_p6, %p1680_p3 }
  0x11   :  { %1690 = shalt.err (!%p1687_p7)
}
  0x12   :  { %31 = dma.hbm_to_vmem [thread:$0]  %s2137_s1, 128, %s29_s16, [#allocation6]  }
  0x13   :  { %s1691_s5 = scalar_lea.hbm %s2136_s0, 128 }
  0x14   :  { %p1692_p8 = scmp.ne.s32.totalorder %s2136_s0, %s1691_s5  ;;  %p1695_p9 = scmp.lt.u32.totalorder %s1691_s5, %s2136_s0 }
  0x16   :  { %p1697_p10 = pnand %p1695_p9, %p1692_p8 }
  0x18   :  { %1700 = shalt.err (!%p1697_p10)
}
  0x19   :  { %s1701_s10 = scalar_lea.vmem %s19_s18, 128  ;;  %p1706_p12 = scmp.lt.s32.totalorder %s19_s18, %s19_s18 }
  0x1a   :  { %p1702_p11 = scmp.ne.s32.totalorder %s19_s18, %s1701_s10  ;;  %p1707_p13 = scmp.lt.s32.totalorder %s1701_s10, %s1701_s10 }
  0x1c   :  { %p1708_p0 = por %p1707_p13, %p1706_p12 }
  0x1e   :  { %p1709_p1 = pnand %p1708_p0, %p1702_p11 }
  0x20   :  { %1712 = shalt.err (!%p1709_p1)
}
  0x21   :  { %21 = dma.hbm_to_vmem [thread:$0]  %s2136_s0, 128, %s19_s18, [#allocation3]  }
  0x22   :  { %s1765_s12 = smov [#allocation7]   ;;  %s1713_s16 = scalar_lea.hbm %s2138_s2, 2048 }
  0x23   :  { %s37_s13 = sshll.u32 %s1765_s12, 4  ;;  %p1714_p2 = scmp.ne.s32.totalorder %s2138_s2, %s1713_s16  ;;  %s38_s13 = int_to_ptr.vmem [resolvable:$true] %s37_s13 }
  0x24   :  { %p1717_p3 = scmp.lt.u32.totalorder %s1713_s16, %s2138_s2 }
  0x26   :  { %p1719_p4 = pnand %p1717_p3, %p1714_p2 }
  0x28   :  { %1722 = shalt.err (!%p1719_p4)
}
  0x29   :  { %s1723_s22 = scalar_lea.vmem %s38_s13, 2048  ;;  %p1728_p6 = scmp.lt.s32.totalorder %s38_s13, %s38_s13 }
  0x2a   :  { %p1724_p5 = scmp.ne.s32.totalorder %s38_s13, %s1723_s22  ;;  %p1729_p7 = scmp.lt.s32.totalorder %s1723_s22, %s1723_s22 }
  0x2c   :  { %p1730_p8 = por %p1729_p7, %p1728_p6 }
  0x2e   :  { %p1731_p9 = pnand %p1730_p8, %p1724_p5 }
  0x30   :  { %1734 = shalt.err (!%p1731_p9)
}
  0x31   :  { %s1766_s0 = smov 128   ;;  %s1767_s18 = smov 8  }
  0x32   :  { %43 = dma.hbm_to_vmem [thread:$0]  %s2138_s2, 2048, %s38_s13, [#allocation6], %s1766_s0, %s1766_s0, %s1767_s18  }
  0x33   :  { %1757 = dma.done.wait [#allocation3], 128  }
  0x34   :  { %1758 = vsyncadd [#allocation3], 4294967168 }
  0x35   :  { %1759 = dma.done.wait [#allocation6], 2176  }
  0x36   :  { %1760 = vsyncadd [#allocation6], 4294965120  ;;  %v1768_v0 = vmov 0.0|0.0   ;;  %vm1769_vm0 = vmmov 0   ;;  %v1770_v1 = vmov 0.0   ;;  %v65_v2 = vld [vmem:[#allocation7 + $0x40] sm:$0xff] }
  0x37   :  { %1516 = vmatprep.subr.bf16.mxu0 %v1768_v0  ;;  %1528 = vmatprep.subr.bf16.mxu1 %v1768_v0  ;;  %v66_v3 = vld [vmem:[#allocation7 + $0x48] sm:$0xff]  ;;  %v67_v4 = vld [vmem:[#allocation7 + $0x50] sm:$0xff]  ;;  %v78_v5 = vand.u32 4294901760, %v65_v2  ;;  %v68_v7 = vld [vmem:[#allocation7 + $0x58] sm:$0xff]  ;;  %vm73_vm1 = vcmask 523264   ;;  %s1771_s26 = smov [#allocation8]  }
  0x38   :  { %1304 = vmatprep.mubr.msk.f32.mxu0 %vm1769_vm0, %v1770_v1  ;;  %1323 = vmatprep.mubr.msk.f32.mxu1 %vm1769_vm0, %v1770_v1  ;;  %v81_v6 = vand.u32 4294901760, %v66_v3  ;;  %v84_v8 = vand.u32 4294901760, %v67_v4  ;;  %v69_v9 = vld [vmem:[#allocation7 + $0x60] sm:$0xff]  ;;  %v70_v10 = vld [vmem:[#allocation7 + $0x68] sm:$0xff]  ;;  %v87_v11 = vand.u32 4294901760, %v68_v7  ;;  %v71_v14 = vld [vmem:[#allocation7 + $0x70] sm:$0xff] }
  0x39   :  { %v90_v12 = vand.u32 4294901760, %v69_v9  ;;  %v93_v13 = vand.u32 4294901760, %v70_v10  ;;  %v1841_v16 = vsub.f32 %v65_v2, %v78_v5  ;;  %v72_v19 = vld [vmem:[#allocation7 + $0x78] sm:$0xff]  ;;  %v96_v26 = vand.u32 4294901760, %v71_v14  ;;  %s1169_s27 = sshll.u32 %s1771_s26, 4  ;;  %s1170_s27 = int_to_ptr.vmem [resolvable:$true] %s1169_s27 }
  0x3a   :  { %v1839_v15 = vpack.c.bf16 %v81_v6, %v78_v5  ;;  %v1843_v17 = vsub.f32 %v66_v3, %v81_v6  ;;  %v1845_v18 = vsub.f32 %v67_v4, %v84_v8  ;;  %v64_v20 = vld [vmem:[#allocation5] sm:$0xff]  ;;  %v1847_v21 = vpack.c.bf16 %v87_v11, %v84_v8  ;;  %s1735_s28 = scalar_lea.vmem %s1170_s27, 128  ;;  %p1740_p11 = scmp.lt.s32.totalorder %s1170_s27, %s1170_s27 }
  0x3b   :  { %v1849_v22 = vsub.f32 %v68_v7, %v87_v11  ;;  %v1852_v23 = vsub.f32 %v69_v9, %v90_v12  ;;  %v163_v24 = vand.u32 4294901760, %v1841_v16  ;;  %v99_v27 = vand.u32 4294901760, %v72_v19  ;;  %v56_v7 = vld [vmem:[#allocation7] sm:$0xff]  ;;  %v57_v9 = vld [vmem:[#allocation7 + $0x8] sm:$0xff]  ;;  %p1736_p10 = scmp.ne.s32.totalorder %s1170_s27, %s1735_s28  ;;  %p1741_p12 = scmp.lt.s32.totalorder %s1735_s28, %s1735_s28 }
  0x3c   :  { %1518 = vmatpush3.bf16.msra.mxu0 %v1839_v15  ;;  %v170_v25 = vand.u32 4294901760, %v1843_v17  ;;  %v177_v28 = vand.u32 4294901760, %v1845_v18  ;;  %v75_v30 = vsel %vm73_vm1, %v64_v20, 0  ;;  %v1860_v31 = vsub.f32 %v70_v10, %v93_v13 }
  0x3d   :  { %1519 = vmatprep.subr.bf16.mxu0 %v1768_v0  ;;  %v184_v29 = vand.u32 4294901760, %v1849_v22  ;;  %v164_v32 = vsub.f32 %v1841_v16, %v163_v24  ;;  %v1868_v34 = vand.u32 4294901760, %v75_v30  ;;  %v1870_v35 = vsub.f32 %v71_v14, %v96_v26  ;;  %v59_v14 = vld [vmem:[#allocation7 + $0x18] sm:$0xff]  ;;  %p1742_p13 = por %p1741_p12, %p1740_p11 }
  0x3e   :  { %v171_v33 = vsub.f32 %v1843_v17, %v170_v25  ;;  %v1872_v36 = vsub.f32 %v72_v19, %v99_v27  ;;  %v178_v37 = vsub.f32 %v1845_v18, %v177_v28  ;;  %v1881_v39 = vpack.c.bf16 %v93_v13, %v90_v12  ;;  %v58_v13 = vld [vmem:[#allocation7 + $0x10] sm:$0xff] }
  0x3f   :  { %v185_v38 = vsub.f32 %v1849_v22, %v184_v29  ;;  %v165_v40 = vand.u32 4294901760, %v164_v32  ;;  %v1884_v42 = vsub.f32 %v75_v30, %v1868_v34  ;;  %v191_v45 = vand.u32 4294901760, %v1852_v23  ;;  %v55_v19 = vld [vmem:[#allocation2] sm:$0xff]  ;;  %p1743_p0 = pnand %p1742_p13, %p1736_p10 }
  0x40   :  { %1521 = vmatpush3.bf16.msra.mxu0 %v1847_v21  ;;  %v172_v41 = vand.u32 4294901760, %v171_v33  ;;  %v179_v43 = vand.u32 4294901760, %v178_v37  ;;  %v198_v48 = vand.u32 4294901760, %v1860_v31  ;;  %v1890_v49 = vpack.c.bf16 %v99_v27, %v96_v26  ;;  %v62_v33 = vld [vmem:[#allocation7 + $0x30] sm:$0xff]  ;;  %v63_v37 = vld [vmem:[#allocation7 + $0x38] sm:$0xff] }
  0x41   :  { %1522 = vmatprep.subr.bf16.mxu0 %v1768_v0  ;;  %v186_v44 = vand.u32 4294901760, %v185_v38  ;;  %v152_v47 = vand.u32 4294901760, %v1884_v42  ;;  %v192_v50 = vsub.f32 %v1852_v23, %v191_v45  ;;  %v205_v51 = vand.u32 4294901760, %v1870_v35 }
  0x42   :  { %v1529_v46 = vpack.c.bf16 %v172_v41, %v165_v40  ;;  %v212_v52 = vand.u32 4294901760, %v1872_v36  ;;  %v199_v55 = vsub.f32 %v1860_v31, %v198_v48  ;;  %v1541_v62 = vpack.c.bf16 %v1843_v17, %v1841_v16 }
  0x43   :  { %v1532_v53 = vpack.c.bf16 %v186_v44, %v179_v43  ;;  %v153_v54 = vsub.f32 %v1884_v42, %v152_v47  ;;  %v193_v56 = vand.u32 4294901760, %v192_v50  ;;  %v206_v57 = vsub.f32 %v1870_v35, %v205_v51 }
  0x44   :  { %1524 = vmatpush3.bf16.msra.mxu0 %v1881_v39  ;;  %1530 = vmatpush3.bf16.msra.mxu1 %v1529_v46  ;;  %v213_v58 = vsub.f32 %v1872_v36, %v212_v52  ;;  %v200_v59 = vand.u32 4294901760, %v199_v55  ;;  %v1544_v4 = vpack.c.bf16 %v1849_v22, %v1845_v18  ;;  %v1547_v5 = vpack.c.bf16 %v1860_v31, %v1852_v23 }
  0x45   :  { %1525 = vmatprep.subr.bf16.mxu0 %v1768_v0  ;;  %1531 = vmatprep.subr.bf16.mxu1 %v1768_v0  ;;  %v154_v60 = vand.u32 4294901760, %v153_v54  ;;  %v207_v63 = vand.u32 4294901760, %v206_v57  ;;  %v1550_v6 = vpack.c.bf16 %v1872_v36, %v1870_v35  ;;  %v1565_v8 = vpack.c.bf16 %v170_v25, %v163_v24  ;;  %v60_v24 = vld [vmem:[#allocation7 + $0x20] sm:$0xff]  ;;  %v61_v25 = vld [vmem:[#allocation7 + $0x28] sm:$0xff] }
  0x46   :  { %v1535_v61 = vpack.c.bf16 %v200_v59, %v193_v56  ;;  %v214_v2 = vand.u32 4294901760, %v213_v58  ;;  %v618_v10 = vand.u32 4294901760, %v56_v7  ;;  %v1568_v11 = vpack.c.bf16 %v184_v29, %v177_v28 }
  0x47   :  { %v621_v12 = vand.u32 4294901760, %v57_v9  ;;  %v624_v17 = vand.u32 4294901760, %v58_v13  ;;  %v1571_v18 = vpack.c.bf16 %v198_v48, %v191_v45  ;;  %v627_v22 = vand.u32 4294901760, %v59_v14 }
  0x48   :  { %1527 = vmatpush3.bf16.msra.mxu0 %v1890_v49  ;;  %1533 = vmatpush3.bf16.msra.mxu1 %v1532_v53  ;;  %v1538_v3 = vpack.c.bf16 %v214_v2, %v207_v63  ;;  %v1952_v16 = vsub.f32 %v56_v7, %v618_v10  ;;  %v615_v27 = vsel %vm73_vm1, %v55_v19, 0  ;;  %v630_v28 = vand.u32 4294901760, %v60_v24 }
  0x49   :  { %1534 = vmatprep.subr.bf16.mxu1 %v1768_v0  ;;  %1540 = vmatprep.subr.bf16.mxu0 %v1768_v0  ;;  %v1959_v20 = vsub.f32 %v57_v9, %v621_v12  ;;  %v1967_v23 = vsub.f32 %v58_v13, %v624_v17  ;;  %v1574_v29 = vpack.c.bf16 %v212_v52, %v205_v51  ;;  %v633_v31 = vand.u32 4294901760, %v61_v25 }
  0x4a   :  { %v703_v26 = vand.u32 4294901760, %v1952_v16  ;;  %v1974_v30 = vsub.f32 %v59_v14, %v627_v22  ;;  %v1979_v38 = vand.u32 4294901760, %v615_v27  ;;  %v1986_v35 = vpack.c.bf16 %v621_v12, %v618_v10 }
  0x4b   :  { %1305 = vmatmul.mubr.f32.vlgmr.msra.gmra.mrb[0].mxu0 %v154_v60  ;;  %v710_v32 = vand.u32 4294901760, %v1959_v20  ;;  %v1988_v36 = vsub.f32 %v60_v24, %v630_v28  ;;  %v636_v40 = vand.u32 4294901760, %v62_v33  ;;  %v717_v41 = vand.u32 4294901760, %v1967_v23 }
  0x4c   :  { %1536 = vmatpush3.bf16.msra.mxu1 %v1535_v61  ;;  %1542 = vmatpush3.bf16.msra.mxu0 %v1541_v62  ;;  %v639_v44 = vand.u32 4294901760, %v63_v37  ;;  %v724_v45 = vand.u32 4294901760, %v1974_v30  ;;  %v2000_v46 = vpack.c.bf16 %v627_v22, %v624_v17  ;;  %v2009_v50 = vsub.f32 %v615_v27, %v1979_v38 }
  0x4d   :  { %1537 = vmatprep.subr.bf16.mxu1 %v1768_v0  ;;  %1543 = vmatprep.subr.bf16.mxu0 %v1768_v0  ;;  %v711_v43 = vsub.f32 %v1959_v20, %v710_v32  ;;  %v2003_v48 = vsub.f32 %v62_v33, %v636_v40  ;;  %v731_v51 = vand.u32 4294901760, %v1988_v36  ;;  %v2022_v56 = vpack.c.bf16 %v633_v31, %v630_v28 }
  0x4e   :  { %1342 = vmatprep.mubr.msk.f32.mxu0 %vm1769_vm0, %v1770_v1  ;;  %v2014_v53 = vsub.f32 %v63_v37, %v639_v44  ;;  %v725_v54 = vsub.f32 %v1974_v30, %v724_v45  ;;  %v692_v57 = vand.u32 4294901760, %v2009_v50  ;;  %v2040_v2 = vpack.c.bf16 %v639_v44, %v636_v40 }
  0x4f   :  { %v712_v52 = vand.u32 4294901760, %v711_v43  ;;  %v732_v58 = vsub.f32 %v1988_v36, %v731_v51  ;;  %v745_v59 = vand.u32 4294901760, %v2003_v48  ;;  %v1613_v9 = vpack.c.bf16 %v1959_v20, %v1952_v16 }
  0x50   :  { %1539 = vmatpush3.bf16.msra.mxu1 %v1538_v3  ;;  %1545 = vmatpush3.bf16.msra.mxu0 %v1544_v4  ;;  %v726_v61 = vand.u32 4294901760, %v725_v54  ;;  %v752_v63 = vand.u32 4294901760, %v2014_v53  ;;  %v1616_v13 = vpack.c.bf16 %v1974_v30, %v1967_v23  ;;  %v1622_v17 = vpack.c.bf16 %v2014_v53, %v2003_v48  ;;  %v1179_v54 = vld [vmem:[%s2139_s3] ss:$0 sm:$0xff] }
  0x51   :  { %1546 = vmatprep.subr.bf16.mxu0 %v1768_v0  ;;  %1552 = vmatprep.subr.bf16.mxu1 %v1768_v0  ;;  %v733_v3 = vand.u32 4294901760, %v732_v58  ;;  %v1637_v19 = vpack.c.bf16 %v710_v32, %v703_v26 }
  0x52   :  { %v1646_v20 = vpack.c.bf16 %v752_v63, %v745_v59 }
  0x53   :  { %1324 = vmatmul.mubr.f32.vlgmr.msra.gmra.mrb[0].mxu1 %v1868_v34 }
  0x54   :  { %1548 = vmatpush3.bf16.msra.mxu0 %v1547_v5  ;;  %1554 = vmatpush3.bf16.msra.mxu1 %v1839_v15 }
  0x55   :  { %1549 = vmatprep.subr.bf16.mxu0 %v1768_v0  ;;  %1555 = vmatprep.subr.bf16.mxu1 %v1768_v0 }
  0x56   :  { %1361 = vmatprep.mubr.msk.f32.mxu1 %vm1769_vm0, %v1770_v1 }
  0x58   :  { %1551 = vmatpush3.bf16.msra.mxu0 %v1550_v6  ;;  %1557 = vmatpush3.bf16.msra.mxu1 %v1847_v21  ;;  %v746_v6 = vsub.f32 %v2003_v48, %v745_v59 }
  0x59   :  { %1558 = vmatprep.subr.bf16.mxu1 %v1768_v0  ;;  %1564 = vmatprep.subr.bf16.mxu0 %v1768_v0 }
  0x5a   :  { %v747_v10 = vand.u32 4294901760, %v746_v6 }
  0x5b   :  { %1343 = vmatmul.mubr.f32.vlgmr.msra.gmra.mrb[2].mxu0 %v1884_v42  ;;  %v1992_v42 = vsub.f32 %v61_v25, %v633_v31 }
  0x5c   :  { %1560 = vmatpush3.bf16.msra.mxu1 %v1881_v39  ;;  %1566 = vmatpush3.bf16.msra.mxu0 %v1565_v8 }
  0x5d   :  { %1561 = vmatprep.subr.bf16.mxu1 %v1768_v0  ;;  %1567 = vmatprep.subr.bf16.mxu0 %v1768_v0  ;;  %v738_v55 = vand.u32 4294901760, %v1992_v42  ;;  %v1619_v14 = vpack.c.bf16 %v1992_v42, %v1988_v36 }
  0x5e   :  { %1380 = vmatprep.mubr.msk.f32.mxu0 %vm1769_vm0, %v1770_v1 }
  0x5f   :  { %v739_v62 = vsub.f32 %v1992_v42, %v738_v55 }
  0x60   :  { %1563 = vmatpush3.bf16.msra.mxu1 %v1890_v49  ;;  %1569 = vmatpush3.bf16.msra.mxu0 %v1568_v11 }
  0x61   :  { %1570 = vmatprep.subr.bf16.mxu0 %v1768_v0  ;;  %1576 = vmatprep.subr.bf16.mxu1 %v1768_v0  ;;  %v740_v5 = vand.u32 4294901760, %v739_v62 }
  0x63   :  { %1362 = vmatmul.mubr.f32.vlgmr.msra.gmra.mrb[2].mxu1 %v152_v47  ;;  %v1607_v8 = vpack.c.bf16 %v740_v5, %v733_v3 }
  0x64   :  { %1572 = vmatpush3.bf16.msra.mxu0 %v1571_v18  ;;  %1578 = vmatpush3.bf16.msra.mxu1 %v1839_v15  ;;  %v704_v15 = vsub.f32 %v1952_v16, %v703_v26  ;;  %v1640_v18 = vpack.c.bf16 %v724_v45, %v717_v41  ;;  %v1643_v16 = vpack.c.bf16 %v738_v55, %v731_v51 }
  0x65   :  { %1573 = vmatprep.subr.bf16.mxu0 %v1768_v0  ;;  %1579 = vmatprep.subr.bf16.mxu1 %v1768_v0 }
  0x66   :  { %1399 = vmatprep.mubr.msk.f32.mxu1 %vm1769_vm0, %v1770_v1  ;;  %v705_v47 = vand.u32 4294901760, %v704_v15 }
  0x68   :  { %1575 = vmatpush3.bf16.msra.mxu0 %v1574_v29  ;;  %1581 = vmatpush3.bf16.msra.mxu1 %v1847_v21  ;;  %v718_v21 = vsub.f32 %v1967_v23, %v717_v41  ;;  %v1601_v60 = vpack.c.bf16 %v712_v52, %v705_v47 }
  0x69   :  { %1582 = vmatprep.subr.bf16.mxu1 %v1768_v0  ;;  %1588 = vmatprep.subr.bf16.mxu0 %v1768_v0 }
  0x6b   :  { %1381 = vmatmul.mubr.f32.vlgmr.msra.gmra.mrb[4].mxu0 %v1868_v34 }
  0x6c   :  { %1584 = vmatpush3.bf16.msra.mxu1 %v1881_v39  ;;  %1590 = vmatpush3.bf16.msra.mxu0 %v1986_v35  ;;  %v719_v39 = vand.u32 4294901760, %v718_v21 }
  0x6d   :  { %1585 = vmatprep.subr.bf16.mxu1 %v1768_v0  ;;  %1591 = vmatprep.subr.bf16.mxu0 %v1768_v0 }
  0x6e   :  { %1418 = vmatprep.mubr.msk.f32.mxu0 %vm1769_vm0, %v1770_v1  ;;  %v1604_v4 = vpack.c.bf16 %v726_v61, %v719_v39 }
  0x70   :  { %1587 = vmatpush3.bf16.msra.mxu1 %v1890_v49  ;;  %1593 = vmatpush3.bf16.msra.mxu0 %v2000_v46  ;;  %v693_v49 = vsub.f32 %v2009_v50, %v692_v57 }
  0x71   :  { %1594 = vmatprep.subr.bf16.mxu0 %v1768_v0  ;;  %1600 = vmatprep.subr.bf16.mxu1 %v1768_v0 }
  0x72   :  { %v694_v7 = vand.u32 4294901760, %v693_v49 }
  0x73   :  { %1400 = vmatmul.mubr.f32.vlgmr.msra.gmra.mrb[4].mxu1 %v1868_v34  ;;  %v753_v34 = vsub.f32 %v2014_v53, %v752_v63 }
  0x74   :  { %1596 = vmatpush3.bf16.msra.mxu0 %v2022_v56  ;;  %1602 = vmatpush3.bf16.msra.mxu1 %v1601_v60 }
  0x75   :  { %1597 = vmatprep.subr.bf16.mxu0 %v1768_v0  ;;  %1603 = vmatprep.subr.bf16.mxu1 %v1768_v0  ;;  %v754_v11 = vand.u32 4294901760, %v753_v34 }
  0x76   :  { %1437 = vmatprep.mubr.msk.f32.mxu1 %vm1769_vm0, %v1770_v1 }
  0x77   :  { %v1610_v12 = vpack.c.bf16 %v754_v11, %v747_v10 }
  0x78   :  { %1599 = vmatpush3.bf16.msra.mxu0 %v2040_v2  ;;  %1605 = vmatpush3.bf16.msra.mxu1 %v1604_v4 }
  0x79   :  { %1606 = vmatprep.subr.bf16.mxu1 %v1768_v0  ;;  %1612 = vmatprep.subr.bf16.mxu0 %v1768_v0 }
  0x7b   :  { %1419 = vmatmul.mubr.f32.vlgmr.msra.gmra.mrb[6].mxu0 %v694_v7 }
  0x7c   :  { %1608 = vmatpush3.bf16.msra.mxu1 %v1607_v8  ;;  %1614 = vmatpush3.bf16.msra.mxu0 %v1613_v9 }
  0x7d   :  { %1609 = vmatprep.subr.bf16.mxu1 %v1768_v0  ;;  %1615 = vmatprep.subr.bf16.mxu0 %v1768_v0 }
  0x7e   :  { %1456 = vmatprep.mubr.msk.f32.mxu0 %vm1769_vm0, %v1770_v1 }
  0x80   :  { %1611 = vmatpush3.bf16.msra.mxu1 %v1610_v12  ;;  %1617 = vmatpush3.bf16.msra.mxu0 %v1616_v13 }
  0x81   :  { %1618 = vmatprep.subr.bf16.mxu0 %v1768_v0  ;;  %1624 = vmatprep.subr.bf16.mxu1 %v1768_v0 }
  0x83   :  { %1438 = vmatmul.mubr.f32.vlgmr.msra.gmra.mrb[6].mxu1 %v1979_v38 }
  0x84   :  { %1620 = vmatpush3.bf16.msra.mxu0 %v1619_v14  ;;  %1626 = vmatpush3.bf16.msra.mxu1 %v1986_v35 }
  0x85   :  { %1621 = vmatprep.subr.bf16.mxu0 %v1768_v0  ;;  %1627 = vmatprep.subr.bf16.mxu1 %v1768_v0 }
  0x86   :  { %1475 = vmatprep.mubr.msk.f32.mxu1 %vm1769_vm0, %v1770_v1 }
  0x88   :  { %1623 = vmatpush3.bf16.msra.mxu0 %v1622_v17  ;;  %1629 = vmatpush3.bf16.msra.mxu1 %v2000_v46 }
  0x89   :  { %1630 = vmatprep.subr.bf16.mxu1 %v1768_v0  ;;  %1636 = vmatprep.subr.bf16.mxu0 %v1768_v0 }
  0x8b   :  { %1457 = vmatmul.mubr.f32.vlgmr.msra.gmra.mrb[8].mxu0 %v2009_v50 }
  0x8c   :  { %1632 = vmatpush3.bf16.msra.mxu1 %v2022_v56  ;;  %1638 = vmatpush3.bf16.msra.mxu0 %v1637_v19 }
  0x8d   :  { %1633 = vmatprep.subr.bf16.mxu1 %v1768_v0  ;;  %1639 = vmatprep.subr.bf16.mxu0 %v1768_v0 }
  0x8e   :  { %1494 = vmatprep.mubr.msk.f32.mxu0 %vm1769_vm0, %v1770_v1 }
  0x90   :  { %1635 = vmatpush3.bf16.msra.mxu1 %v2040_v2  ;;  %1641 = vmatpush3.bf16.msra.mxu0 %v1640_v18 }
  0x91   :  { %1642 = vmatprep.subr.bf16.mxu0 %v1768_v0  ;;  %1648 = vmatprep.subr.bf16.mxu1 %v1768_v0 }
  0x93   :  { %1476 = vmatmul.mubr.f32.vlgmr.msra.gmra.mrb[8].mxu1 %v692_v57 }
  0x94   :  { %1644 = vmatpush3.bf16.msra.mxu0 %v1643_v16  ;;  %1650 = vmatpush3.bf16.msra.mxu1 %v1986_v35 }
  0x95   :  { %1645 = vmatprep.subr.bf16.mxu0 %v1768_v0  ;;  %1651 = vmatprep.subr.bf16.mxu1 %v1768_v0 }
  0x96   :  { %1513 = vmatprep.mubr.msk.f32.mxu1 %vm1769_vm0, %v1770_v1 }
  0x98   :  { %1647 = vmatpush3.bf16.msra.mxu0 %v1646_v20  ;;  %1653 = vmatpush3.bf16.msra.mxu1 %v2000_v46 }
  0x99   :  { %1654 = vmatprep.subr.bf16.mxu1 %v1768_v0 }
  0x9b   :  { %1495 = vmatmul.mubr.f32.vlgmr.msra.gmra.mrb[10].mxu0 %v1979_v38 }
  0x9c   :  { %1656 = vmatpush3.bf16.msra.mxu1 %v2022_v56 }
  0x9d   :  { %1657 = vmatprep.subr.bf16.mxu1 %v1768_v0 }
  0xa0   :  { %1659 = vmatpush3.bf16.msra.mxu1 %v2040_v2 }
  0xa3   :  { %1514 = vmatmul.mubr.f32.vlgmr.msra.gmra.mrb[10].mxu1 %v1979_v38 }
 0x11e   :  { %v156_v22 = vpop.f32.mrb[0].mxu0 }
 0x11f   :  { %v1306_v24 = vpop.f32.mrb[1].mxu0 }
 0x126   :  { %v267_v25 = vpop.f32.mrb[0].mxu1 }
 0x127   :  { %v268_v26 = vadd.f32 %v267_v25, %v156_v22  ;;  %v1325_v1 = vpop.f32.mrb[1].mxu1 }
 0x12e   :  { %v355_v27 = vpop.f32.mrb[2].mxu0 }
 0x12f   :  { %v356_v23 = vadd.f32 %v355_v27, %v268_v26  ;;  %v1344_v28 = vpop.f32.mrb[3].mxu0 }
 0x136   :  { %v436_v29 = vpop.f32.mrb[2].mxu1 }
 0x137   :  { %v437_v30 = vadd.f32 %v436_v29, %v356_v23  ;;  %v1363_v31 = vpop.f32.mrb[3].mxu1 }
 0x13e   :  { %v531_v32 = vpop.f32.mrb[4].mxu0 }
 0x13f   :  { %v532_v33 = vadd.f32 %v531_v32, %v437_v30  ;;  %v1382_v37 = vpop.f32.mrb[5].mxu0 }
 0x146   :  { %v610_v15 = vpop.f32.mrb[4].mxu1 }
 0x147   :  { %v611_v0 = vadd.f32 %v610_v15, %v532_v33  ;;  %v1401_v35 = vpop.f32.mrb[5].mxu1 }
 0x14e   :  { %v696_v36 = vpop.f32.mrb[6].mxu0 }
 0x14f   :  { %v697_v40 = vadd.f32 %v696_v36, %v611_v0  ;;  %v1420_v38 = vpop.f32.mrb[7].mxu0 }
 0x156   :  { %v807_v41 = vpop.f32.mrb[6].mxu1 }
 0x157   :  { %v808_v42 = vadd.f32 %v807_v41, %v697_v40  ;;  %v1439_v43 = vpop.f32.mrb[7].mxu1 }
 0x15e   :  { %v895_v44 = vpop.f32.mrb[8].mxu0 }
 0x15f   :  { %v896_v45 = vadd.f32 %v895_v44, %v808_v42  ;;  %v1458_v46 = vpop.f32.mrb[9].mxu0 }
 0x166   :  { %v976_v47 = vpop.f32.mrb[8].mxu1 }
 0x167   :  { %v977_v48 = vadd.f32 %v976_v47, %v896_v45  ;;  %v1477_v21 = vpop.f32.mrb[9].mxu1 }
 0x16e   :  { %v1071_v50 = vpop.f32.mrb[10].mxu0 }
 0x16f   :  { %v1072_v51 = vadd.f32 %v1071_v50, %v977_v48  ;;  %v1496_v52 = vpop.f32.mrb[11].mxu0 }
 0x176   :  { %v1150_v53 = vpop.f32.mrb[10].mxu1 }
 0x177   :  { %v1151_v55 = vadd.f32 %v1150_v53, %v1072_v51  ;;  %v1515_v56 = vpop.f32.mrb[11].mxu1 }
 0x179   :  { %v1161_v39 = vadd.f32 %v1179_v54, %v1151_v55 }
 0x17b   :  { %1162 = vst [vmem:[#allocation8] sm:$0xff] %v1161_v39 }
 0x17c   :  { %1746 = shalt.err (!%p1743_p0)
}
 0x17d   :  { %s1747_s5 = scalar_lea.hbm %s2140_s4, 128 }
 0x17e   :  { %p1748_p1 = scmp.ne.s32.totalorder %s2140_s4, %s1747_s5  ;;  %p1751_p2 = scmp.lt.u32.totalorder %s1747_s5, %s2140_s4 }
 0x180   :  { %p1753_p3 = pnand %p1751_p2, %p1748_p1 }
 0x182   :  { %1756 = shalt.err (!%p1753_p3)
}
 0x183   :  { %1172 = dma.vmem_to_hbm [thread:$0]  %s1170_s27, 128, %s2140_s4, [#allocation4]  }
 0x184   :  { %1761 = dma.done.wait [#allocation4], 128  }
 0x185   :  { %1762 = vsyncadd [#allocation4], 4294967168 }
 0x186   :  { %1176 = vsyncpa [#allocation3], 1 }
 0x187   :  { %1177 = vsyncpa [#allocation6], 1 }
 0x188   :  { %1178 = vsyncpa [#allocation4], 1 }

</bundles_post_ra>
